<compile_context>
chip_gen: v5e
topology: v5e:2x2
jax: 0.10.0
libtpu: 0.0.40
codegen_flags: <defaults>
</compile_context>

<pallas_src>
import functools

import jax
import jax.numpy as jnp
from jax.experimental import pallas as pl
from jax.experimental.pallas import tpu as pltpu

_LANE = 128
_SUBLANE = 8
_MAX_BLOCK_ROWS = 2048      # 2048 * 128 * 4B = 1 MiB per f32 input tile
_NUM_PARALLEL = 2           # shards the reduction across TensorCores (v7x)


def _round_up(v, m):
    return ((v + m - 1) // m) * m


def _tversky_kernel(x_ref, t_ref, o_pt_ref, o_p_ref, o_t_ref,
                    acc_pt, acc_p, acc_t,
                    *, n_valid, block_rows, steps_per_slice, needs_mask):
    p_id = pl.program_id(0)
    i = pl.program_id(1)

    @pl.when(i == 0)
    def _():
        acc_pt[...] = jnp.zeros_like(acc_pt)
        acc_p[...] = jnp.zeros_like(acc_p)
        acc_t[...] = jnp.zeros_like(acc_t)

    x = x_ref[...].astype(jnp.float32)
    t = t_ref[...].astype(jnp.float32)
    # sigmoid(x) == 0.5 * tanh(0.5 * x) + 0.5  (single EUP transcendental).
    p = 0.5 * jnp.tanh(0.5 * x) + 0.5

    if needs_mask:
        # Global element index of each lane in this *logical* block; elements
        # at or beyond n_valid are padding / out-of-bounds garbage.
        blk = p_id * steps_per_slice + i
        row = jax.lax.broadcasted_iota(jnp.int32, (block_rows, _LANE), 0)
        lane = jax.lax.broadcasted_iota(jnp.int32, (block_rows, _LANE), 1)
        gidx = blk * (block_rows * _LANE) + row * _LANE + lane
        mask = gidx < n_valid
        p = jnp.where(mask, p, 0.0)
        t = jnp.where(mask, t, 0.0)

    # Lane-parallel accumulation: fold whole vregs onto (8, 128) accumulators
    # (pure VALU adds); the cross-lane reduction happens once, in the wrapper.
    acc_pt[...] += jnp.sum((p * t).reshape(-1, _SUBLANE, _LANE), axis=0)
    acc_p[...] += jnp.sum(p.reshape(-1, _SUBLANE, _LANE), axis=0)
    acc_t[...] += jnp.sum(t.reshape(-1, _SUBLANE, _LANE), axis=0)

    @pl.when(i == pl.num_programs(1) - 1)
    def _():
        o_pt_ref[...] = acc_pt[...]
        o_p_ref[...] = acc_p[...]
        o_t_ref[...] = acc_t[...]


def tversky_loss(inputs, targets, smooth=1.0, alpha=0.5, beta=0.5):
    """Pallas implementation of TverskyLoss.forward (returns a scalar f32)."""
    x = jnp.ravel(inputs)            # keep native dtype (bf16 stays bf16)
    t = jnp.ravel(targets)
    n = x.shape[0]

    # Lane-dense layout: (rows, 128) with rows a multiple of 8.
    rows = _round_up(pl.cdiv(n, _LANE), _SUBLANE)
    padded = rows * _LANE
    if padded != n:
        # Only hit when numel % 128 != 0; the in-kernel mask makes the pad
        # value irrelevant.
        x = jnp.pad(x, (0, padded - n))
        t = jnp.pad(t, (0, padded - n))
    x2 = x.reshape(rows, _LANE)
    t2 = t.reshape(rows, _LANE)

    block_rows = min(_MAX_BLOCK_ROWS, rows)
    total_blocks = pl.cdiv(rows, block_rows)
    num_parallel = _NUM_PARALLEL
    steps = pl.cdiv(total_blocks, num_parallel)
    needs_mask = (num_parallel * steps * block_rows * _LANE) != n

    def in_index_map(pi, si):
        blk = pi * steps + si
        # Clamp logical overhang blocks; the in-kernel mask zeroes their
        # contribution anyway.
        return (jnp.minimum(blk, total_blocks - 1), 0)

    kernel = functools.partial(
        _tversky_kernel,
        n_valid=n, block_rows=block_rows,
        steps_per_slice=steps, needs_mask=needs_mask)

    part_shape = jax.ShapeDtypeStruct(
        (num_parallel, _SUBLANE, _LANE), jnp.float32)
    out_spec = pl.BlockSpec((None, _SUBLANE, _LANE),
                            lambda pi, si: (pi, 0, 0))

    bytes_in = x2.size * x2.dtype.itemsize + t2.size * t2.dtype.itemsize
    cost = pl.CostEstimate(
        flops=8 * n,
        transcendentals=n,
        bytes_accessed=bytes_in + 3 * num_parallel * _SUBLANE * _LANE * 4)

    s_pt, s_p, s_t = pl.pallas_call(
        kernel,
        out_shape=(part_shape, part_shape, part_shape),
        grid_spec=pltpu.PrefetchScalarGridSpec(
            num_scalar_prefetch=0,
            grid=(num_parallel, steps),
            in_specs=[
                pl.BlockSpec((block_rows, _LANE), in_index_map),
                pl.BlockSpec((block_rows, _LANE), in_index_map),
            ],
            out_specs=(out_spec, out_spec, out_spec),
            scratch_shapes=[
                pltpu.VMEM((_SUBLANE, _LANE), jnp.float32),  # sum(p*t)
                pltpu.VMEM((_SUBLANE, _LANE), jnp.float32),  # sum(p)
                pltpu.VMEM((_SUBLANE, _LANE), jnp.float32),  # sum(t)
            ],
        ),
        compiler_params=pltpu.CompilerParams(
            dimension_semantics=("parallel", "arbitrary"),
            vmem_limit_bytes=32 * 1024 * 1024),
        cost_estimate=cost,
    )(x2, t2)

    tp = jnp.sum(s_pt)
    sum_p = jnp.sum(s_p)
    sum_t = jnp.sum(s_t)
    fp = sum_p - tp
    fn = sum_t - tp
    tversky = (tp + smooth) / (tp + alpha * fp + beta * fn + smooth)
    return (1.0 - tversky).astype(jnp.float32)


def _reference(inputs, targets, smooth=1.0, alpha=0.5, beta=0.5):
    p = jax.nn.sigmoid(inputs.astype(jnp.float32)).reshape(-1)
    t = targets.astype(jnp.float32).reshape(-1)
    tp = jnp.sum(p * t)
    fp = jnp.sum((1.0 - t) * p)
    fn = jnp.sum(t * (1.0 - p))
    return 1.0 - (tp + smooth) / (tp + alpha * fp + beta * fn + smooth)


if __name__ == "__main__":
    key = jax.random.PRNGKey(0)
    k1, k2, k3, k4 = jax.random.split(key, 4)

    # NCHW logits and binary targets (numel = 2048, lane-aligned path).
    x = jax.random.normal(k1, (2, 4, 16, 16), dtype=jnp.float32)
    tgt = (jax.random.uniform(k2, (2, 4, 16, 16)) > 0.5).astype(jnp.float32)
    loss = tversky_loss(x, tgt)
    jax.block_until_ready(loss)
    ref = _reference(x, tgt)
    assert jnp.allclose(loss, ref, atol=1e-5, rtol=1e-5), (loss, ref)

    # Ragged shape (numel = 1530, exercises the padded / masked tail path).
    xr = jax.random.normal(k3, (2, 3, 15, 17), dtype=jnp.float32)
    tr = (jax.random.uniform(k4, (2, 3, 15, 17)) > 0.5).astype(jnp.float32)
    loss_r = tversky_loss(xr, tr)
    jax.block_until_ready(loss_r)
    ref_r = _reference(xr, tr)
    assert jnp.allclose(loss_r, ref_r, atol=1e-5, rtol=1e-5), (loss_r, ref_r)

    print("KERNEL_OK")
</pallas_src>

<mosaic_0001>
module attributes {stable_mosaic.version = 11 : i64} {
  func.func @_tversky_kernel(%arg0: i32, %arg1: i32, %arg2: memref<16x128xf32, #tpu.memory_space<vmem>>, %arg3: memref<16x128xf32, #tpu.memory_space<vmem>>, %arg4: memref<1x8x128xf32, #tpu.memory_space<vmem>>, %arg5: memref<1x8x128xf32, #tpu.memory_space<vmem>>, %arg6: memref<1x8x128xf32, #tpu.memory_space<vmem>>, %arg7: memref<8x128xf32, #tpu.memory_space<vmem>>, %arg8: memref<8x128xf32, #tpu.memory_space<vmem>>, %arg9: memref<8x128xf32, #tpu.memory_space<vmem>>) attributes {dimension_semantics = [#tpu.dimension_semantics<parallel>, #tpu.dimension_semantics<arbitrary>], iteration_bounds = array<i64: 2, 1>, scalar_prefetch = 0 : i64, scratch_operands = 3 : i64, tpu.core_type = #tpu.core_type<tc>, window_params = [{transform_indices = @transform_0, window_bounds = array<i64: 16, 128>}, {transform_indices = @transform_1, window_bounds = array<i64: 16, 128>}, {transform_indices = @transform_2, window_bounds = array<i64: 1, 8, 128>}, {transform_indices = @transform_3, window_bounds = array<i64: 1, 8, 128>}, {transform_indices = @transform_4, window_bounds = array<i64: 1, 8, 128>}]} {
    %c0_i32 = arith.constant 0 : i32
    %0 = arith.cmpi eq, %arg1, %c0_i32 : i32
    %1 = arith.extui %0 : i1 to i32
    %c0_i32_0 = arith.constant 0 : i32
    %2 = arith.cmpi ne, %1, %c0_i32_0 : i32
    scf.if %2 {
      %cst_26 = arith.constant 0.000000e+00 : f32
      %47 = vector.broadcast %cst_26 : f32 to vector<8x128xf32>
      %c0_27 = arith.constant 0 : index
      %c0_28 = arith.constant 0 : index
      %48 = vector.load %arg7[%c0_27, %c0_28] : memref<8x128xf32, #tpu.memory_space<vmem>>, vector<8x128xf32>
      tpu.vector_store %arg7[%c0_27, %c0_28], %47 {strides = array<i32>} : memref<8x128xf32, #tpu.memory_space<vmem>>, vector<8x128xf32>,
      %cst_29 = arith.constant 0.000000e+00 : f32
      %49 = vector.broadcast %cst_29 : f32 to vector<8x128xf32>
      %c0_30 = arith.constant 0 : index
      %c0_31 = arith.constant 0 : index
      %50 = vector.load %arg8[%c0_30, %c0_31] : memref<8x128xf32, #tpu.memory_space<vmem>>, vector<8x128xf32>
      tpu.vector_store %arg8[%c0_30, %c0_31], %49 {strides = array<i32>} : memref<8x128xf32, #tpu.memory_space<vmem>>, vector<8x128xf32>,
      %cst_32 = arith.constant 0.000000e+00 : f32
      %51 = vector.broadcast %cst_32 : f32 to vector<8x128xf32>
      %c0_33 = arith.constant 0 : index
      %c0_34 = arith.constant 0 : index
      %52 = vector.load %arg9[%c0_33, %c0_34] : memref<8x128xf32, #tpu.memory_space<vmem>>, vector<8x128xf32>
      tpu.vector_store %arg9[%c0_33, %c0_34], %51 {strides = array<i32>} : memref<8x128xf32, #tpu.memory_space<vmem>>, vector<8x128xf32>,
    } else {
    }
    %c0 = arith.constant 0 : index
    %c0_1 = arith.constant 0 : index
    %3 = vector.load %arg2[%c0, %c0_1] : memref<16x128xf32, #tpu.memory_space<vmem>>, vector<16x128xf32>
    %c0_2 = arith.constant 0 : index
    %c0_3 = arith.constant 0 : index
    %4 = vector.load %arg3[%c0_2, %c0_3] : memref<16x128xf32, #tpu.memory_space<vmem>>, vector<16x128xf32>
    %cst = arith.constant 5.000000e-01 : f32
    %5 = vector.broadcast %cst : f32 to vector<16x128xf32>
    %6 = arith.mulf %5, %3 : vector<16x128xf32>
    %7 = math.tanh %6 : vector<16x128xf32>
    %cst_4 = arith.constant 5.000000e-01 : f32
    %8 = vector.broadcast %cst_4 : f32 to vector<16x128xf32>
    %9 = arith.mulf %8, %7 : vector<16x128xf32>
    %cst_5 = arith.constant 5.000000e-01 : f32
    %10 = vector.broadcast %cst_5 : f32 to vector<16x128xf32>
    %11 = arith.addf %9, %10 : vector<16x128xf32>
    %c1_i32 = arith.constant 1 : i32
    %12 = arith.muli %arg0, %c1_i32 : i32
    %13 = arith.addi %12, %arg1 : i32
    %14 = tpu.iota {dimensions = array<i32: 0>} : vector<16x128xi32>
    %15 = tpu.iota {dimensions = array<i32: 1>} : vector<16x128xi32>
    %c2048_i32 = arith.constant 2048 : i32
    %16 = arith.muli %13, %c2048_i32 : i32
    %c128_i32 = arith.constant 128 : i32
    %17 = vector.broadcast %c128_i32 : i32 to vector<16x128xi32>
    %18 = arith.muli %14, %17 : vector<16x128xi32>
    %19 = vector.broadcast %16 : i32 to vector<16x128xi32>
    %20 = arith.addi %19, %18 : vector<16x128xi32>
    %21 = arith.addi %20, %15 : vector<16x128xi32>
    %c2048_i32_6 = arith.constant 2048 : i32
    %22 = vector.broadcast %c2048_i32_6 : i32 to vector<16x128xi32>
    %23 = arith.cmpi slt, %21, %22 : vector<16x128xi32>
    %cst_7 = arith.constant 0.000000e+00 : f32
    %24 = vector.broadcast %cst_7 : f32 to vector<16x128xf32>
    %25 = arith.select %23, %11, %24 : vector<16x128xi1>, vector<16x128xf32>
    %cst_8 = arith.constant 0.000000e+00 : f32
    %26 = vector.broadcast %cst_8 : f32 to vector<16x128xf32>
    %27 = arith.select %23, %4, %26 : vector<16x128xi1>, vector<16x128xf32>
    %c0_9 = arith.constant 0 : index
    %c0_10 = arith.constant 0 : index
    %28 = vector.load %arg7[%c0_9, %c0_10] : memref<8x128xf32, #tpu.memory_space<vmem>>, vector<8x128xf32>
    %29 = arith.mulf %25, %27 : vector<16x128xf32>
    %30 = vector.shape_cast %29 : vector<16x128xf32> to vector<2x8x128xf32>
    %cst_11 = arith.constant dense<0.000000e+00> : vector<8x128xf32>
    %31 = vector.multi_reduction <add>, %30, %cst_11 [0] : vector<2x8x128xf32> to vector<8x128xf32>
    %32 = arith.addf %28, %31 : vector<8x128xf32>
    %c0_12 = arith.constant 0 : index
    %c0_13 = arith.constant 0 : index
    %33 = vector.load %arg7[%c0_12, %c0_13] : memref<8x128xf32, #tpu.memory_space<vmem>>, vector<8x128xf32>
    tpu.vector_store %arg7[%c0_12, %c0_13], %32 {strides = array<i32>} : memref<8x128xf32, #tpu.memory_space<vmem>>, vector<8x128xf32>,
    %c0_14 = arith.constant 0 : index
    %c0_15 = arith.constant 0 : index
    %34 = vector.load %arg8[%c0_14, %c0_15] : memref<8x128xf32, #tpu.memory_space<vmem>>, vector<8x128xf32>
    %35 = vector.shape_cast %25 : vector<16x128xf32> to vector<2x8x128xf32>
    %cst_16 = arith.constant dense<0.000000e+00> : vector<8x128xf32>
    %36 = vector.multi_reduction <add>, %35, %cst_16 [0] : vector<2x8x128xf32> to vector<8x128xf32>
    %37 = arith.addf %34, %36 : vector<8x128xf32>
    %c0_17 = arith.constant 0 : index
    %c0_18 = arith.constant 0 : index
    %38 = vector.load %arg8[%c0_17, %c0_18] : memref<8x128xf32, #tpu.memory_space<vmem>>, vector<8x128xf32>
    tpu.vector_store %arg8[%c0_17, %c0_18], %37 {strides = array<i32>} : memref<8x128xf32, #tpu.memory_space<vmem>>, vector<8x128xf32>,
    %c0_19 = arith.constant 0 : index
    %c0_20 = arith.constant 0 : index
    %39 = vector.load %arg9[%c0_19, %c0_20] : memref<8x128xf32, #tpu.memory_space<vmem>>, vector<8x128xf32>
    %40 = vector.shape_cast %27 : vector<16x128xf32> to vector<2x8x128xf32>
    %cst_21 = arith.constant dense<0.000000e+00> : vector<8x128xf32>
    %41 = vector.multi_reduction <add>, %40, %cst_21 [0] : vector<2x8x128xf32> to vector<8x128xf32>
    %42 = arith.addf %39, %41 : vector<8x128xf32>
    %c0_22 = arith.constant 0 : index
    %c0_23 = arith.constant 0 : index
    %43 = vector.load %arg9[%c0_22, %c0_23] : memref<8x128xf32, #tpu.memory_space<vmem>>, vector<8x128xf32>
    tpu.vector_store %arg9[%c0_22, %c0_23], %42 {strides = array<i32>} : memref<8x128xf32, #tpu.memory_space<vmem>>, vector<8x128xf32>,
    %c0_i32_24 = arith.constant 0 : i32
    %44 = arith.cmpi eq, %arg1, %c0_i32_24 : i32
    %45 = arith.extui %44 : i1 to i32
    %c0_i32_25 = arith.constant 0 : i32
    %46 = arith.cmpi ne, %45, %c0_i32_25 : i32
    scf.if %46 {
      %c0_26 = arith.constant 0 : index
      %c0_27 = arith.constant 0 : index
      %47 = vector.load %arg7[%c0_26, %c0_27] : memref<8x128xf32, #tpu.memory_space<vmem>>, vector<8x128xf32>
      %c0_28 = arith.constant 0 : index
      %c0_29 = arith.constant 0 : index
      %c0_30 = arith.constant 0 : index
      %48 = vector.load %arg4[%c0_28, %c0_29, %c0_30] : memref<1x8x128xf32, #tpu.memory_space<vmem>>, vector<1x8x128xf32>
      %49 = vector.shape_cast %48 : vector<1x8x128xf32> to vector<8x128xf32>
      %50 = vector.shape_cast %47 : vector<8x128xf32> to vector<1x8x128xf32>
      tpu.vector_store %arg4[%c0_28, %c0_29, %c0_30], %50 {strides = array<i32>} : memref<1x8x128xf32, #tpu.memory_space<vmem>>, vector<1x8x128xf32>,
      %c0_31 = arith.constant 0 : index
      %c0_32 = arith.constant 0 : index
      %51 = vector.load %arg8[%c0_31, %c0_32] : memref<8x128xf32, #tpu.memory_space<vmem>>, vector<8x128xf32>
      %c0_33 = arith.constant 0 : index
      %c0_34 = arith.constant 0 : index
      %c0_35 = arith.constant 0 : index
      %52 = vector.load %arg5[%c0_33, %c0_34, %c0_35] : memref<1x8x128xf32, #tpu.memory_space<vmem>>, vector<1x8x128xf32>
      %53 = vector.shape_cast %52 : vector<1x8x128xf32> to vector<8x128xf32>
      %54 = vector.shape_cast %51 : vector<8x128xf32> to vector<1x8x128xf32>
      tpu.vector_store %arg5[%c0_33, %c0_34, %c0_35], %54 {strides = array<i32>} : memref<1x8x128xf32, #tpu.memory_space<vmem>>, vector<1x8x128xf32>,
      %c0_36 = arith.constant 0 : index
      %c0_37 = arith.constant 0 : index
      %55 = vector.load %arg9[%c0_36, %c0_37] : memref<8x128xf32, #tpu.memory_space<vmem>>, vector<8x128xf32>
      %c0_38 = arith.constant 0 : index
      %c0_39 = arith.constant 0 : index
      %c0_40 = arith.constant 0 : index
      %56 = vector.load %arg6[%c0_38, %c0_39, %c0_40] : memref<1x8x128xf32, #tpu.memory_space<vmem>>, vector<1x8x128xf32>
      %57 = vector.shape_cast %56 : vector<1x8x128xf32> to vector<8x128xf32>
      %58 = vector.shape_cast %55 : vector<8x128xf32> to vector<1x8x128xf32>
      tpu.vector_store %arg6[%c0_38, %c0_39, %c0_40], %58 {strides = array<i32>} : memref<1x8x128xf32, #tpu.memory_space<vmem>>, vector<1x8x128xf32>,
    } else {
    }
    return
  }
  func.func @transform_0(%arg0: i32, %arg1: i32) -> (i32, i32) {
    %c1_i32 = arith.constant 1 : i32
    %0 = arith.muli %arg0, %c1_i32 : i32
    %1 = arith.addi %0, %arg1 : i32
    %c0_i32 = arith.constant 0 : i32
    %2 = arith.minsi %1, %c0_i32 : i32
    %c0_i32_0 = arith.constant 0 : i32
    %c0_i32_1 = arith.constant 0 : i32
    return %2, %c0_i32_0 : i32, i32
  }
  func.func @transform_1(%arg0: i32, %arg1: i32) -> (i32, i32) {
    %c1_i32 = arith.constant 1 : i32
    %0 = arith.muli %arg0, %c1_i32 : i32
    %1 = arith.addi %0, %arg1 : i32
    %c0_i32 = arith.constant 0 : i32
    %2 = arith.minsi %1, %c0_i32 : i32
    %c0_i32_0 = arith.constant 0 : i32
    %c0_i32_1 = arith.constant 0 : i32
    return %2, %c0_i32_0 : i32, i32
  }
  func.func @transform_2(%arg0: i32, %arg1: i32) -> (i32, i32, i32) {
    %c0_i32 = arith.constant 0 : i32
    %c0_i32_0 = arith.constant 0 : i32
    %c0_i32_1 = arith.constant 0 : i32
    return %arg0, %c0_i32, %c0_i32_0 : i32, i32, i32
  }
  func.func @transform_3(%arg0: i32, %arg1: i32) -> (i32, i32, i32) {
    %c0_i32 = arith.constant 0 : i32
    %c0_i32_0 = arith.constant 0 : i32
    %c0_i32_1 = arith.constant 0 : i32
    return %arg0, %c0_i32, %c0_i32_0 : i32, i32, i32
  }
  func.func @transform_4(%arg0: i32, %arg1: i32) -> (i32, i32, i32) {
    %c0_i32 = arith.constant 0 : i32
    %c0_i32_0 = arith.constant 0 : i32
    %c0_i32_1 = arith.constant 0 : i32
    return %arg0, %c0_i32, %c0_i32_0 : i32, i32, i32
  }
}

</mosaic_0001>

<bundles_post_ra>
// kernel: tpu_custom_call.1
= control target key start
LH: loop header
LB: loop body
LE: loop exit
PB: predicated region body
PF: predicated region fallthrough
CT: control target
= control target key end

     0   :  { %s1241_s0 = inlined_call_operand.hbm [shape: f32[16,128], index: 0, kind: input, shape index: {}]   ;;  %s1242_s1 = inlined_call_operand.hbm [shape: f32[16,128], index: 1, kind: input, shape index: {}]   ;;  %s1243_s2 = inlined_call_operand.hbm [shape: f32[2,8,128], index: 2, kind: output, shape index: {0}]   ;;  %s1244_s3 = inlined_call_operand.hbm [shape: f32[2,8,128], index: 3, kind: output, shape index: {1}]   ;;  %s1245_s4 = inlined_call_operand.hbm [shape: f32[2,8,128], index: 4, kind: output, shape index: {2}]  }
   0x1   :  { %1248 = sst [smem:[#allocation18_spill]] %s1241_s0 }
   0x2   :  { %1249 = sst [smem:[#allocation19_spill]] %s1242_s1 }
   0x3   :  { %10 = vsyncpa [#allocation6], 0 }
   0x4   :  { %12 = vsyncpa [#allocation6 + $0x1], 0 }
   0x5   :  { %13 = vsyncpa [#allocation9], 0 }
   0x6   :  { %15 = vsyncpa [#allocation9 + $0x1], 0 }
   0x7   :  { %16 = vsyncpa [#allocation7], 0 }
   0x8   :  { %18 = vsyncpa [#allocation7 + $0x1], 0 }
   0x9   :  { %19 = vsyncpa [#allocation12], 0 }
   0xa   :  { %21 = vsyncpa [#allocation12 + $0x1], 0  ;;  %s988_s15 = smov 0   ;;  %s990_s16 = smov 0  }
   0xb   :  { %s992_s17 = smov 0   ;;  %s994_s18 = smov 0  }
   0xc   :  { %s996_s19 = smov 0   ;;  %s998_s20 = smov 0  }
   0xd   :  { %s1000_s21 = smov 0   ;;  %s1002_s22 = smov 0  }
   0xe LB: > { %s1027_s23 = sadd.s32 4294967295, %s957_s22   ;;  %s1246_s24 = sadd.s32 4294967294, %s957_s22   ;;  %s957_s22 = sphi %s1002_s22, %s27_s22   ;;  %s953_s21 = sphi %s1000_s21, %s1265_s21   ;;  %s949_s20 = sphi %s998_s20, %s1264_s20   ;;  %s945_s19 = sphi %s996_s19, %s1231_s19   ;;  %s941_s18 = sphi %s994_s18, %s1263_s18   ;;  %s937_s17 = sphi %s992_s17, %s1262_s17   ;;  %s933_s16 = sphi %s990_s16, %s1261_s16   ;;  %s929_s15 = sphi %s988_s15, %s1260_s15  }
   0xf   : > { %s39_s25 = sadd.s32 1, %s953_s21  ;;  %p926_p1 = scmp.ne.s32.totalorder %s945_s19, 0 }
  0x10   : > { %p41_p0 = scmp.ge.s32.totalorder %s39_s25, 2  ;;  %p60_p2 = scmp.eq.s32.totalorder %s957_s22, 0 }
  0x11   : > { %p65_p3 = scmp.ne.s32.totalorder %s945_s19, %s941_s18  ;;  %p66_p5 = scmp.eq.s32.totalorder %s1027_s23, 0 }
  0x12   : > { %s1267_s25 = smov (%p41_p0, %s39_s25), 0  ;;  %p1036_p4 = por %p926_p1, %p60_p2 }
  0x13   : > { %p1041_p6 = por %p66_p5, %p65_p3  ;;  %s107_s28 = ssub.s32 %s953_s21, %s1267_s25 }
  0x14   : > { %p108_p7 = scmp.eq.s32.totalorder %s107_s28, 0  ;;  %s110_s29 = sadd.s32 1, %s937_s17 }
  0x15   : > { %p120_p8 = scmp.ne.s32.totalorder %s937_s17, %s933_s16  ;;  %p121_p9 = scmp.eq.s32.totalorder %s1027_s23, 1 }
  0x16   : > { %s1049_s30 = scalar_select %p108_p7, %s937_s17, %s110_s29  }
  0x17   : > { %p126_p10 = scmp.ne.s32.totalorder %s933_s16, %s929_s15  ;;  %p127_p11 = scmp.eq.s32.totalorder %s1246_s24, 1 }
  0x18   : > { %p1058_p12 = por %p121_p9, %p120_p8  ;;  %p599_p13 = scmp.ge.s32.totalorder %s957_s22, 2 }
  0x19   : > { %p1063_p0 = por %p127_p11, %p126_p10  ;;  %p650_p1 = scmp.lt.s32.totalorder %s957_s22, 2 }
  0x1a   : > { %s1254_s0 = sld [smem:[#allocation18_spill]]  ;;  %s959_s10 = smov [#allocation5]  }
  0x1b   : > { %s214_s11 = sshll.u32 %s959_s10, 4  ;;  %p1073_p2 = pnand %p650_p1, %p1036_p4  ;;  %s215_s11 = int_to_ptr.vmem [resolvable:$true] %s214_s11 }
  0x1c   : > { %p606_p3 = scmp.ge.s32.totalorder %s957_s22, 1  ;;  %p247_p5 = scmp.lt.s32.totalorder %s957_s22, 3 }
  0x1d   : > { %p734_p8 = pneg %p1073_p2 }
  0x20   : > { %s212_s9 = sshll.u32 %s1254_s0, 4  ;;  %s737_s28 = scalar_lea.hbm %s1254_s0, 16  ;;  %s213_s9 = int_to_ptr.hbm [resolvable:$true] %s212_s9 }
  0x21   : > { %s730_s13 = sshra.s32 %s213_s9, 4  ;;  %s731_s13 = int_to_ptr.hbm [resolvable:$true] %s730_s13 }
  0x22   : > { %s732_s14 = scalar_lea.hbm %s731_s13, 16 }
  0x23   : > { %p733_p7 = scmp.ne.s32.totalorder %s731_s13, %s732_s14  ;;  %p739_p4 = scmp.lt.s32.totalorder %s737_s28, %s732_s14 }
  0x25   : > { %p735_p9 = pnand %p734_p8, %p733_p7 }
  0x27   : > { %p736_p10 = pneg %p735_p9 }
  0x29   : > { %p741_p11 = pnand %p739_p4, %p736_p10 }
  0x2b   : > { %744 = shalt.err (!%p741_p11)
}
  0x2c   : > { %s960_s29 = smov 128   ;;  %s961_s7 = smov 8  }
  0x2d   : > { %636 = dma.hbm_to_vmem [thread:$0]  (!%p1073_p2), %s213_s9, 256, %s215_s11, [#allocation6], %s960_s29, %s960_s29, %s961_s7  }
  0x2e   : > { %p1093_p1 = pnand %p606_p3, %p247_p5  ;;  %s1257_s1 = sld [smem:[#allocation19_spill]] }
  0x2f   : > { %s962_s18 = smov [#allocation8]  }
  0x30   : > { %s239_s26 = sshll.u32 %s962_s18, 4  ;;  %s240_s26 = int_to_ptr.vmem [resolvable:$true] %s239_s26 }
  0x34   : > { %s237_s14 = sshll.u32 %s1257_s1, 4  ;;  %s767_s0 = scalar_lea.hbm %s1257_s1, 16  ;;  %s238_s14 = int_to_ptr.hbm [resolvable:$true] %s237_s14 }
  0x35   : > { %s760_s28 = sshra.s32 %s238_s14, 4  ;;  %s761_s28 = int_to_ptr.hbm [resolvable:$true] %s760_s28 }
  0x36   : > { %s762_s24 = scalar_lea.hbm %s761_s28, 16 }
  0x37   : > { %p763_p7 = scmp.ne.s32.totalorder %s761_s28, %s762_s24  ;;  %p769_p3 = scmp.lt.s32.totalorder %s767_s0, %s762_s24 }
  0x39   : > { %p765_p9 = pnand %p763_p7, %p734_p8 }
  0x3b   : > { %p766_p10 = pneg %p765_p9 }
  0x3d   : > { %p771_p5 = pnand %p769_p3, %p766_p10 }
  0x3f   : > { %774 = shalt.err (!%p771_p5)
}
  0x40   : > { %639 = dma.hbm_to_vmem [thread:$0]  (!%p1073_p2), %s238_s14, 256, %s240_s26, [#allocation9], %s960_s29, %s960_s29, %s961_s7  }
  0x41   : > { %251 = sbr.rel (%p1093_p1) target bundleno = 125 (0x7d), region = 28  ;;  %s253_s10 = sand.u32 (!%p1093_p1), 1, %s945_s19  }
  0x42   : > { %s607_s13 = sshll.u32 (!%p1093_p1), %s253_s10, 4  ;;  %s254_s18 = scalar_lea.sflag (!%p1093_p1), [#allocation6], %s253_s10 }
  0x43   : > { %s257_s28 = scalar_lea.vmem (!%p1093_p1), [#allocation5], %s607_s13 }
  0x46   : > { %911 = dma.done.wait (%p1041_p6), %s254_s18, 256  }
  0x47   : > { %913 = vsyncadd (%p1041_p6), %s254_s18, 4294967040  ;;  %s264_s0 = scalar_lea.sflag [#allocation9], %s253_s10  ;;  %s267_s24 = scalar_lea.vmem [#allocation8], %s607_s13 }
  0x48   : > { %915 = dma.done.wait (%p1041_p6), %s264_s0, 256  }
  0x49   : > { %917 = vsyncadd (%p1041_p6), %s264_s0, 4294967040  ;;  %v336_v0 = vlaneseq  ;;  %s612_s12 = sshll.u32 %s949_s20, 11  ;;  %s1247_s29 = sand.u32 1, %s933_s16   ;;  %v323_v8 = vld [vmem:[%s257_s28] sm:$0xff]  ;;  %v324_v9 = vld [vmem:[%s257_s28 + $0x8] sm:$0xff] }
  0x4a   : > { %v344_v2 = vstv %s612_s12  ;;  %v327_v10 = vmul.f32 0.5, %v323_v8  ;;  %v328_v11 = vmul.f32 0.5, %v324_v9  ;;  %s1123_s27 = sshll.u32 %s1247_s29, 3  ;;  %v325_v15 = vld [vmem:[%s267_s24] sm:$0xff]  ;;  %v326_v16 = vld [vmem:[%s267_s24 + $0x8] sm:$0xff]  ;;  %s616_s7 = sshll.u32 %s949_s20, 3 }
  0x4b   : > { %v337_v1 = vshrl.u32 %v336_v0, 7  ;;  %v340_v4 = vand.u32 127, %v336_v0  ;;  %s307_s8 = scalar_lea.vmem [#allocation13], %s1123_s27  ;;  %s300_s14 = scalar_lea.vmem [#allocation11], %s1123_s27 }
  0x4c   : > { %726 = vtanh.f32 %v327_v10  ;;  %s1130_s26 = sshll.u32 %s300_s14, 4  ;;  %s413_s10 = scalar_lea.hbm %s1244_s3, %s616_s7  ;;  %s416_s26 = int_to_ptr.vmem [resolvable:$true] %s1130_s26 }
  0x4d   : > { %v338_v3 = vadd.s32 8, %v337_v1  ;;  %v342_v5 = vmul.u32 128, %v337_v1  ;;  %728 = vtanh.f32 %v328_v11  ;;  %s383_s13 = sand.u32 1, %s1027_s23   ;;  %s427_s0 = scalar_lea.hbm %s1245_s4, %s616_s7 }
  0x4e   : > { %s293_s20 = scalar_lea.vmem [#allocation10], %s1123_s27  ;;  %s399_s1 = scalar_lea.hbm %s1243_s2, %s616_s7 }
  0x4f   : > { %v343_v6 = vmul.u32 128, %v338_v3  ;;  %v345_v7 = vadd.s32 %v344_v2, %v342_v5  ;;  %s1142_s24 = sshll.u32 %s293_s20, 4  ;;  %s1148_s9 = sshll.u32 %s413_s10, 4  ;;  %s402_s24 = int_to_ptr.vmem [resolvable:$true] %s1142_s24  ;;  %s418_s9 = int_to_ptr.hbm [resolvable:$true] %s1148_s9 }
  0x50   : > { %s1151_s23 = sshll.u32 %s307_s8, 4  ;;  %s1153_s11 = sshll.u32 %s427_s0, 4  ;;  %s430_s23 = int_to_ptr.vmem [resolvable:$true] %s1151_s23  ;;  %s432_s11 = int_to_ptr.hbm [resolvable:$true] %s1153_s11 }
  0x51   : > { %v346_v12 = vadd.s32 %v344_v2, %v343_v6  ;;  %v347_v13 = vadd.s32 %v345_v7, %v340_v4  ;;  %s1157_s29 = sshll.u32 %s399_s1, 4  ;;  %s384_s7 = scalar_lea.sflag [#allocation12], %s383_s13  ;;  %s404_s29 = int_to_ptr.hbm [resolvable:$true] %s1157_s29 }
  0x52   : > { %v727_v20 = vpop.eup %726  ;;  %s810_s28 = scalar_lea.hbm %s1244_s3, 16 }
  0x53   : > { %v348_v14 = vadd.s32 %v346_v12, %v340_v4  ;;  %vm349_vm0 = vcmp.lt.s32.totalorder %v347_v13, 2048  ;;  %v729_v21 = vpop.eup %728  ;;  %v331_v22 = vmul.f32 0.5, %v727_v20 }
  0x54   : > { %v353_v17 = vsel %vm349_vm0, %v325_v15, 0.0  ;;  %v332_v23 = vmul.f32 0.5, %v729_v21 }
  0x55   : > { %vm350_vm1 = vcmp.lt.s32.totalorder %v348_v14, 2048  ;;  %v333_v24 = vadd.f32 0.5, %v331_v22 }
  0x56   : > { %v354_v18 = vsel %vm350_vm1, %v326_v16, 0.0  ;;  %v334_v25 = vadd.f32 0.5, %v332_v23 }
  0x57   : > { %v366_v19 = vadd.f32 %v354_v18, %v353_v17  ;;  %v351_v26 = vsel %vm349_vm0, %v333_v24, 0.0 }
  0x58   : > { %v352_v27 = vsel %vm350_vm1, %v334_v25, 0.0  ;;  %v356_v28 = vmul.f32 %v353_v17, %v351_v26 }
  0x59   : > { %377 = vst [vmem:[%s307_s8] sm:$0xff] %v366_v19  ;;  %v362_v29 = vadd.f32 %v352_v27, %v351_v26  ;;  %v357_v30 = vmul.f32 %v354_v18, %v352_v27  ;;  %s804_s8 = sshra.s32 %s418_s9, 4  ;;  %s805_s8 = int_to_ptr.hbm [resolvable:$true] %s804_s8 }
  0x5a   : > { %s806_s10 = scalar_lea.hbm %s805_s8, 8  ;;  %p811_p4 = scmp.lt.s32.totalorder %s805_s8, %s1244_s3 }
  0x5b   : > { %375 = vst [vmem:[%s300_s14] sm:$0xff] %v362_v29  ;;  %v358_v31 = vadd.f32 %v357_v30, %v356_v28  ;;  %p807_p6 = scmp.ne.s32.totalorder %s805_s8, %s806_s10  ;;  %p812_p11 = scmp.lt.s32.totalorder %s810_s28, %s806_s10 }
  0x5d   : > { %p808_p2 = pnand %p807_p6, %p1058_p12  ;;  %p813_p1 = por %p812_p11, %p811_p4 }
  0x5f   : > { %p809_p8 = pneg %p808_p2 }
  0x61   : > { %p814_p7 = pnand %p813_p1, %p809_p8 }
  0x63   : > { %817 = shalt.err (!%p814_p7)
}
  0x64   : > { %628 = dma.vmem_to_hbm [thread:$0]  (%p1058_p12), %s416_s26, 128, %s418_s9, %s384_s7   ;;  %373 = vst [vmem:[%s293_s20] sm:$0xff] %v358_v31 }
  0x65   : > { %s832_s14 = sshra.s32 %s432_s11, 4  ;;  %s838_s18 = scalar_lea.hbm %s1245_s4, 16  ;;  %s833_s14 = int_to_ptr.hbm [resolvable:$true] %s832_s14 }
  0x66   : > { %s834_s13 = scalar_lea.hbm %s833_s14, 8  ;;  %p839_p5 = scmp.lt.s32.totalorder %s833_s14, %s1245_s4 }
  0x67   : > { %p835_p9 = scmp.ne.s32.totalorder %s833_s14, %s834_s13  ;;  %p840_p6 = scmp.lt.s32.totalorder %s838_s18, %s834_s13 }
  0x69   : > { %p836_p10 = pnand %p835_p9, %p1058_p12  ;;  %p841_p2 = por %p840_p6, %p839_p5 }
  0x6b   : > { %p837_p3 = pneg %p836_p10 }
  0x6d   : > { %p842_p8 = pnand %p841_p2, %p837_p3 }
  0x6f   : > { %845 = shalt.err (!%p842_p8)
}
  0x70   : > { %629 = dma.vmem_to_hbm [thread:$0]  (%p1058_p12), %s430_s23, 128, %s432_s11, %s384_s7  }
  0x71   : > { %s1258_s27 = sand.u32 1, %s933_s16   ;;  %s860_s20 = sshra.s32 %s404_s29, 4  ;;  %s861_s20 = int_to_ptr.hbm [resolvable:$true] %s860_s20 }
  0x72   : > { %s379_s26 = scalar_lea.sflag [#allocation7], %s1258_s27  ;;  %s862_s9 = scalar_lea.hbm %s861_s20, 8 }
  0x73   : > { %p863_p4 = scmp.ne.s32.totalorder %s861_s20, %s862_s9  ;;  %s866_s14 = scalar_lea.hbm %s1243_s2, 16 }
  0x74   : > { %p867_p7 = scmp.lt.s32.totalorder %s861_s20, %s1243_s2  ;;  %p868_p9 = scmp.lt.s32.totalorder %s866_s14, %s862_s9 }
  0x75   : > { %p864_p11 = pnand %p863_p4, %p1058_p12 }
  0x76   : > { %p869_p10 = por %p868_p9, %p867_p7 }
  0x77   : > { %p865_p1 = pneg %p864_p11 }
  0x79   : > { %p870_p3 = pnand %p869_p10, %p865_p1 }
  0x7b   : > { %873 = shalt.err (!%p870_p3)
}
  0x7c   : > { %627 = dma.vmem_to_hbm [thread:$0]  (%p1058_p12), %s402_s24, 128, %s404_s29, %s379_s26  }
  0x7d PF: > { %s443_s23 = sand.u32 1, %s929_s15   ;;  %p641_p5 = pnand %p599_p13, %p1063_p0 }
  0x7e   : > { %s444_s11 = scalar_lea.sflag [#allocation7], %s443_s23 }
  0x7f   : > { %p642_p6 = pneg %p641_p5 }
  0x81   : > { %919 = dma.done.wait (%p642_p6), %s444_s11, 128  }
  0x82   : > { %921 = vsyncadd (%p642_p6), %s444_s11, 4294967168  ;;  %s1259_s7 = sadd.s32 4294967294, %s957_s22  }
  0x83   : > { %s453_s5 = sand.u32 1, %s1259_s7  }
  0x84   : > { %s454_s10 = scalar_lea.sflag [#allocation12], %s453_s5 }
  0x85   : > { %923 = dma.done.wait (%p642_p6), %s454_s10, 256  }
  0x86   : > { %925 = vsyncadd (%p642_p6), %s454_s10, 4294967040  ;;  %s27_s22 = sadd.s32 1, %s957_s22   ;;  %s1260_s15 = smov %s933_s16 }
  0x87   : > { %p24_p12 = scmp.ge.s32.totalorder %s27_s22, 4   ;;  %s1261_s16 = smov %s937_s17 }
  0x88   : > { %s1262_s17 = smov %s1049_s30  ;;  %s1263_s18 = smov %s945_s19 }
  0x89   : > { %s1231_s19 = smov 0   ;;  %s1264_s20 = smov %s953_s21 }
  0x8a   : > { %s1265_s21 = smov %s1267_s25  ;;  %26 = sbr.rel (!%p24_p12) target bundleno = 14 (0xe), region = 126 }
  0x8f   :  { %470 = vsyncpa [#allocation6], 1 }
  0x90   :  { %472 = vsyncpa [#allocation6 + $0x1], 1 }
  0x91   :  { %473 = vsyncpa [#allocation9], 1 }
  0x92   :  { %475 = vsyncpa [#allocation9 + $0x1], 1 }
  0x93   :  { %476 = vsyncpa [#allocation7], 1 }
  0x94   :  { %478 = vsyncpa [#allocation7 + $0x1], 1 }
  0x95   :  { %479 = vsyncpa [#allocation12], 1 }
  0x96   :  { %481 = vsyncpa [#allocation12 + $0x1], 1 }

</bundles_post_ra>
